<compile_context>
chip_gen: v6e
topology: v6e:2x2x1
jax: 0.10.0
libtpu: 0.0.40
codegen_flags: <defaults>
</compile_context>

<pallas_src>
import collections
import functools

import jax
import jax.numpy as jnp
from jax.experimental import pallas as pl
from jax.experimental.pallas import tpu as pltpu


# Lightweight stand-in for torch.distributions.Normal.
Normal = collections.namedtuple("Normal", ["loc", "scale"])

NormalParams = collections.namedtuple(
    "NormalParams", ["w_packed", "b_packed", "num_inputs", "num_outputs"]
)

_LANE = 128      # TPU lane width
_SUBLANE = 8     # f32 sublane granularity
_MAX_TB = 1024   # batch-tile cap (v6e plateau region; budget check below)


def _round_up(n, m):
    return ((n + m - 1) // m) * m


def _cdiv(a, b):
    return -(-a // b)


def _vmem_capacity_bytes():
    """Best-effort query of per-core VMEM capacity; conservative fallback."""
    try:
        info = pltpu.get_tpu_info()
        for name in ("vmem_capacity_bytes", "vmem_size_bytes", "vmem_bytes"):
            cap = getattr(info, name, None)
            if cap:
                return int(cap)
    except Exception:
        pass
    return 64 * 1024 * 1024  # v7x per-TC size; safe lower bound everywhere


def pack_normal_params(w_mean, b_mean, w_std, b_std, *, matmul_dtype=jnp.bfloat16):
    """One-time packing of both linear heads into a single lane-dense weight.

    w_*: (Din, Dout); b_*: (Dout,) or (1, Dout).
    Returns NormalParams with w_packed (Din, Npad) in `matmul_dtype` and
    b_packed (1, Npad) in float32, Npad = round_up(2*Dout, 128).
    """
    w_mean = jnp.asarray(w_mean, jnp.float32)
    w_std = jnp.asarray(w_std, jnp.float32)
    b_mean = jnp.reshape(jnp.asarray(b_mean, jnp.float32), (1, -1))
    b_std = jnp.reshape(jnp.asarray(b_std, jnp.float32), (1, -1))

    din, dout = w_mean.shape
    npad = _round_up(2 * dout, _LANE)

    w = jnp.zeros((din, npad), jnp.float32)
    w = w.at[:, :dout].set(w_mean).at[:, dout:2 * dout].set(w_std)
    b = jnp.zeros((1, npad), jnp.float32)
    b = b.at[:, :dout].set(b_mean).at[:, dout:2 * dout].set(b_std)

    return NormalParams(
        w_packed=w.astype(matmul_dtype),
        b_packed=b,
        num_inputs=int(din),
        num_outputs=int(dout),
    )


def _normal_kernel(x_ref, w_ref, b_ref, out_ref, *, dout):
    """Fused kernel: one MXU matmul feeding both heads.

    y    = x @ [W_mean | W_std | 0] + [b_mean | b_std | 0]     (TB, Npad)
    out  = where(col >= dout, exp(y), y)
           -> cols [0:dout]       = mean
              cols [dout:2*dout]  = stddev = exp(logits)   (strictly positive)
              cols [2*dout:Npad]  = padding (discarded by the wrapper)
    """
    x = x_ref[...].astype(w_ref.dtype)  # bf16 cast in-register (MXU-native path)
    y = jnp.dot(x, w_ref[...], preferred_element_type=jnp.float32) + b_ref[...]
    col = jax.lax.broadcasted_iota(jnp.int32, y.shape, 1)
    out_ref[...] = jnp.where(col >= dout, jnp.exp(y), y)  # exp on EUP (free slot)


def normal_module_forward(x, params, *, use_pallas=None):
    """Forward pass. x: (B, Din) float; params: NormalParams.

    Returns Normal(loc=(B, Dout), scale=(B, Dout)), scale > 0.
    """
    x = jnp.asarray(x, jnp.float32)
    B, din = x.shape
    if din != params.num_inputs:
        raise ValueError(f"expected Din={params.num_inputs}, got {din}")
    dout = params.num_outputs
    npad = params.w_packed.shape[1]

    if use_pallas is None:
        # Tiny problems: launch/DMA overhead dominates; let XLA fuse it.
        use_pallas = B * npad >= 8 * 1024

    if not use_pallas:
        y = jnp.dot(
            x.astype(params.w_packed.dtype),
            params.w_packed,
            preferred_element_type=jnp.float32,
        ) + params.b_packed
        return Normal(loc=y[:, :dout], scale=jnp.exp(y[:, dout:2 * dout]))

    # ---- VMEM-budget-derived batch tile -----------------------------------
    vmem_cap = _vmem_capacity_bytes()
    vmem_limit = min(int(vmem_cap * 0.9), 112 * 1024 * 1024)
    budget = int(vmem_limit * 0.7)
    w_bytes = params.w_packed.size * jnp.dtype(params.w_packed.dtype).itemsize
    b_bytes = params.b_packed.size * 4
    fixed = 2 * (w_bytes + b_bytes)              # conservative (double-buffered)
    per_row = 2 * 4 * (din + npad)               # double-buffered f32 x + out rows
    tb_budget = max(_SUBLANE, ((budget - fixed) // per_row) // _SUBLANE * _SUBLANE)
    tb_cap = max(_SUBLANE, min(_MAX_TB, tb_budget))

    n_tiles = _cdiv(B, tb_cap)
    if B >= 2 * _SUBLANE:
        n_tiles = max(n_tiles, 2)                # keep both v7x TensorCores busy
    tb = min(tb_cap, _round_up(_cdiv(B, n_tiles), _SUBLANE))
    if _cdiv(B, tb) == 1:
        tb = B                                   # single full-extent block (no pad)
    grid = (_cdiv(B, tb),)

    kernel = functools.partial(_normal_kernel, dout=dout)

    def build(weight_pipeline_mode):
        spec_kwargs = (
            {} if weight_pipeline_mode is None
            else {"pipeline_mode": weight_pipeline_mode}
        )
        return pl.pallas_call(
            kernel,
            out_shape=jax.ShapeDtypeStruct((B, npad), jnp.float32),
            grid_spec=pltpu.PrefetchScalarGridSpec(
                num_scalar_prefetch=0,
                grid=grid,
                in_specs=[
                    # activations: tiled over batch (ragged last tile allowed)
                    pl.BlockSpec((tb, din), lambda i: (i, 0)),
                    # packed weights / bias: VMEM-resident, constant index_map
                    pl.BlockSpec((din, npad), lambda i: (0, 0), **spec_kwargs),
                    pl.BlockSpec((1, npad), lambda i: (0, 0), **spec_kwargs),
                ],
                out_specs=pl.BlockSpec((tb, npad), lambda i: (i, 0)),
            ),
            compiler_params=pltpu.CompilerParams(
                dimension_semantics=("parallel",),   # 2 TCs on v7x; no-op elsewhere
                vmem_limit_bytes=vmem_limit,
            ),
        )

    try:
        # Single-buffer the grid-invariant weight/bias operands.
        y = build(pl.Buffered(buffer_count=1))(x, params.w_packed, params.b_packed)
        y = jax.block_until_ready(y)
    except Exception:
        # Older JAX without pipeline_mode support: default double buffering.
        y = build(None)(x, params.w_packed, params.b_packed)

    return Normal(loc=y[:, :dout], scale=y[:, dout:2 * dout])


if __name__ == "__main__":
    num_inputs, num_outputs = 32, 8

    key = jax.random.PRNGKey(0)
    kx1, kx2, kwm, kbm, kws, kbs = jax.random.split(key, 6)

    # Deterministic parameter init (PyTorch nn.Linear-style uniform bound).
    bound = 1.0 / (num_inputs ** 0.5)
    w_mean = jax.random.uniform(kwm, (num_inputs, num_outputs), jnp.float32, -bound, bound)
    b_mean = jax.random.uniform(kbm, (num_outputs,), jnp.float32, -bound, bound)
    w_std = jax.random.uniform(kws, (num_inputs, num_outputs), jnp.float32, -bound, bound)
    b_std = jax.random.uniform(kbs, (num_outputs,), jnp.float32, -bound, bound)

    # Hoisted, one-time packing (bf16 fused weight).
    params = pack_normal_params(w_mean, b_mean, w_std, b_std)

    def ref_f32(xv):
        mean = xv @ w_mean + b_mean[None, :]
        std = jnp.exp(xv @ w_std + b_std[None, :])
        return mean, std

    def ref_matched(xv):
        # Same bf16-input / f32-accumulate math as the kernel.
        y = jnp.dot(
            xv.astype(jnp.bfloat16).astype(jnp.float32),
            params.w_packed.astype(jnp.float32),
        ) + params.b_packed
        return y[:, :num_outputs], jnp.exp(y[:, num_outputs:2 * num_outputs])

    # --- test 1: tiny shape -> pure-jnp fallback path (typical policy usage) ---
    x_small = jax.random.normal(kx1, (8, num_inputs), dtype=jnp.float32)
    d_small = normal_module_forward(x_small, params)          # auto -> fallback
    rm, rs = ref_f32(x_small)
    assert d_small.loc.shape == (8, num_outputs)
    assert d_small.scale.shape == (8, num_outputs)
    assert jnp.allclose(d_small.loc, rm, atol=2e-2, rtol=2e-2)
    assert jnp.allclose(d_small.scale, rs, atol=2e-2, rtol=2e-2)

    # --- test 2: Pallas kernel path (ragged batch, >=2 grid tiles) -------------
    batch = 100
    x_big = jax.random.normal(kx2, (batch, num_inputs), dtype=jnp.float32)
    dist = normal_module_forward(x_big, params, use_pallas=True)
    jax.block_until_ready(dist.loc)
    jax.block_until_ready(dist.scale)

    rm32, rs32 = ref_f32(x_big)
    rmm, rsm = ref_matched(x_big)
    assert dist.loc.shape == (batch, num_outputs)
    assert dist.scale.shape == (batch, num_outputs)
    # Tight check vs. bf16-matched reference; loose check vs. f32 reference.
    assert jnp.allclose(dist.loc, rmm, atol=1e-4, rtol=1e-4)
    assert jnp.allclose(dist.scale, rsm, atol=1e-4, rtol=1e-4)
    assert jnp.allclose(dist.loc, rm32, atol=2e-2, rtol=2e-2)
    assert jnp.allclose(dist.scale, rs32, atol=2e-2, rtol=2e-2)
    assert bool(jnp.all(dist.scale > 0.0))

    print("KERNEL_OK")
</pallas_src>

<mosaic_0001>
module attributes {stable_mosaic.version = 11 : i64} {
  func.func @_normal_kernel(%arg0: i32, %arg1: memref<56x32xf32, #tpu.memory_space<vmem>>, %arg2: memref<32x128xbf16, #tpu.memory_space<vmem>>, %arg3: memref<1x128xf32, #tpu.memory_space<vmem>>, %arg4: memref<56x128xf32, #tpu.memory_space<vmem>>) attributes {dimension_semantics = [#tpu.dimension_semantics<parallel>], iteration_bounds = array<i64: 2>, scalar_prefetch = 0 : i64, scratch_operands = 0 : i64, tpu.core_type = #tpu.core_type<tc>, window_params = [{transform_indices = @transform_0, window_bounds = array<i64: 56, 32>}, {pipeline_mode = #tpu.pipeline_mode<synchronous>, transform_indices = @transform_1, window_bounds = array<i64: 32, 128>}, {pipeline_mode = #tpu.pipeline_mode<synchronous>, transform_indices = @transform_2, window_bounds = array<i64: 1, 128>}, {transform_indices = @transform_3, window_bounds = array<i64: 56, 128>}]} {
    %c0 = arith.constant 0 : index
    %c0_0 = arith.constant 0 : index
    %0 = vector.load %arg1[%c0, %c0_0] : memref<56x32xf32, #tpu.memory_space<vmem>>, vector<56x32xf32>
    %1 = arith.truncf %0 : vector<56x32xf32> to vector<56x32xbf16>
    %c0_1 = arith.constant 0 : index
    %c0_2 = arith.constant 0 : index
    %2 = vector.load %arg2[%c0_1, %c0_2] : memref<32x128xbf16, #tpu.memory_space<vmem>>, vector<32x128xbf16>
    %cst = arith.constant dense<0.000000e+00> : vector<56x128xf32>
    %3 = tpu.matmul %1, %2, %cst {dimension_numbers = #tpu.dot_dimension_numbers<[1], [0], [0], [1], [0, 0, 1, 1], [], []>} : vector<56x32xbf16>, vector<32x128xbf16>, vector<56x128xf32> -> vector<56x128xf32>
    %c0_3 = arith.constant 0 : index
    %c0_4 = arith.constant 0 : index
    %4 = vector.load %arg3[%c0_3, %c0_4] : memref<1x128xf32, #tpu.memory_space<vmem>>, vector<1x128xf32>
    %5 = vector.broadcast %4 : vector<1x128xf32> to vector<56x128xf32>
    %6 = arith.addf %3, %5 : vector<56x128xf32>
    %7 = tpu.iota {dimensions = array<i32: 1>} : vector<56x128xi32>
    %c8_i32 = arith.constant 8 : i32
    %8 = vector.broadcast %c8_i32 : i32 to vector<56x128xi32>
    %9 = arith.cmpi sge, %7, %8 : vector<56x128xi32>
    %10 = math.exp %6 : vector<56x128xf32>
    %11 = arith.select %9, %10, %6 : vector<56x128xi1>, vector<56x128xf32>
    %c0_5 = arith.constant 0 : index
    %c0_6 = arith.constant 0 : index
    %12 = vector.load %arg4[%c0_5, %c0_6] : memref<56x128xf32, #tpu.memory_space<vmem>>, vector<56x128xf32>
    tpu.vector_store %arg4[%c0_5, %c0_6], %11 {strides = array<i32>} : memref<56x128xf32, #tpu.memory_space<vmem>>, vector<56x128xf32>,
    return
  }
  func.func @transform_0(%arg0: i32) -> (i32, i32) {
    %c0_i32 = arith.constant 0 : i32
    %c0_i32_0 = arith.constant 0 : i32
    return %arg0, %c0_i32 : i32, i32
  }
  func.func @transform_1(%arg0: i32) -> (i32, i32) {
    %c0_i32 = arith.constant 0 : i32
    %c0_i32_0 = arith.constant 0 : i32
    %c0_i32_1 = arith.constant 0 : i32
    return %c0_i32, %c0_i32_0 : i32, i32
  }
  func.func @transform_2(%arg0: i32) -> (i32, i32) {
    %c0_i32 = arith.constant 0 : i32
    %c0_i32_0 = arith.constant 0 : i32
    %c0_i32_1 = arith.constant 0 : i32
    return %c0_i32, %c0_i32_0 : i32, i32
  }
  func.func @transform_3(%arg0: i32) -> (i32, i32) {
    %c0_i32 = arith.constant 0 : i32
    %c0_i32_0 = arith.constant 0 : i32
    return %arg0, %c0_i32 : i32, i32
  }
}

module attributes {stable_mosaic.version = 11 : i64} {
  func.func @_normal_kernel(%arg0: i32, %arg1: memref<56x32xf32, #tpu.memory_space<vmem>>, %arg2: memref<32x128xbf16, #tpu.memory_space<vmem>>, %arg3: memref<1x128xf32, #tpu.memory_space<vmem>>, %arg4: memref<56x128xf32, #tpu.memory_space<vmem>>) attributes {dimension_semantics = [#tpu.dimension_semantics<parallel>], iteration_bounds = array<i64: 2>, scalar_prefetch = 0 : i64, scratch_operands = 0 : i64, tpu.core_type = #tpu.core_type<tc>, window_params = [{transform_indices = @transform_0, window_bounds = array<i64: 56, 32>}, {pipeline_mode = #tpu.pipeline_mode<synchronous>, transform_indices = @transform_1, window_bounds = array<i64: 32, 128>}, {pipeline_mode = #tpu.pipeline_mode<synchronous>, transform_indices = @transform_2, window_bounds = array<i64: 1, 128>}, {transform_indices = @transform_3, window_bounds = array<i64: 56, 128>}]} {
    %c0 = arith.constant 0 : index
    %c0_0 = arith.constant 0 : index
    %0 = vector.load %arg1[%c0, %c0_0] : memref<56x32xf32, #tpu.memory_space<vmem>>, vector<56x32xf32>
    %1 = arith.truncf %0 : vector<56x32xf32> to vector<56x32xbf16>
    %c0_1 = arith.constant 0 : index
    %c0_2 = arith.constant 0 : index
    %2 = vector.load %arg2[%c0_1, %c0_2] : memref<32x128xbf16, #tpu.memory_space<vmem>>, vector<32x128xbf16>
    %cst = arith.constant dense<0.000000e+00> : vector<56x128xf32>
    %3 = tpu.matmul %1, %2, %cst {dimension_numbers = #tpu.dot_dimension_numbers<[1], [0], [0], [1], [0, 0, 1, 1], [], []>} : vector<56x32xbf16>, vector<32x128xbf16>, vector<56x128xf32> -> vector<56x128xf32>
    %c0_3 = arith.constant 0 : index
    %c0_4 = arith.constant 0 : index
    %4 = vector.load %arg3[%c0_3, %c0_4] : memref<1x128xf32, #tpu.memory_space<vmem>>, vector<1x128xf32>
    %5 = vector.broadcast %4 : vector<1x128xf32> to vector<56x128xf32>
    %6 = arith.addf %3, %5 : vector<56x128xf32>
    %7 = tpu.iota {dimensions = array<i32: 1>} : vector<56x128xi32>
    %c8_i32 = arith.constant 8 : i32
    %8 = vector.broadcast %c8_i32 : i32 to vector<56x128xi32>
    %9 = arith.cmpi sge, %7, %8 : vector<56x128xi32>
    %10 = math.exp %6 : vector<56x128xf32>
    %11 = arith.select %9, %10, %6 : vector<56x128xi1>, vector<56x128xf32>
    %c0_5 = arith.constant 0 : index
    %c0_6 = arith.constant 0 : index
    %12 = vector.load %arg4[%c0_5, %c0_6] : memref<56x128xf32, #tpu.memory_space<vmem>>, vector<56x128xf32>
    tpu.vector_store %arg4[%c0_5, %c0_6], %11 {strides = array<i32>} : memref<56x128xf32, #tpu.memory_space<vmem>>, vector<56x128xf32>,
    return
  }
  func.func @transform_0(%arg0: i32) -> (i32, i32) {
    %c0_i32 = arith.constant 0 : i32
    %c0_i32_0 = arith.constant 0 : i32
    return %arg0, %c0_i32 : i32, i32
  }
  func.func @transform_1(%arg0: i32) -> (i32, i32) {
    %c0_i32 = arith.constant 0 : i32
    %c0_i32_0 = arith.constant 0 : i32
    %c0_i32_1 = arith.constant 0 : i32
    return %c0_i32, %c0_i32_0 : i32, i32
  }
  func.func @transform_2(%arg0: i32) -> (i32, i32) {
    %c0_i32 = arith.constant 0 : i32
    %c0_i32_0 = arith.constant 0 : i32
    %c0_i32_1 = arith.constant 0 : i32
    return %c0_i32, %c0_i32_0 : i32, i32
  }
  func.func @transform_3(%arg0: i32) -> (i32, i32) {
    %c0_i32 = arith.constant 0 : i32
    %c0_i32_0 = arith.constant 0 : i32
    return %arg0, %c0_i32 : i32, i32
  }
}

</mosaic_0001>

<bundles_post_ra>
// kernel: tpu_custom_call.1
= control target key start
LH: loop header
LB: loop body
LE: loop exit
PB: predicated region body
PF: predicated region fallthrough
CT: control target
= control target key end

     0   :  { %8 = vsyncpa [#allocation3], 0  ;;  %s751_s0 = inlined_call_operand.vmem [shape: f32[100,32], index: 0, kind: input, shape index: {}]   ;;  %s752_s1 = inlined_call_operand.vmem [shape: bf16[32,128], index: 1, kind: input, shape index: {}]   ;;  %s753_s2 = inlined_call_operand.vmem [shape: f32[1,128], index: 2, kind: input, shape index: {}]   ;;  %s754_s3 = inlined_call_operand.hbm [shape: f32[100,128], index: 3, kind: output, shape index: {}]  }
   0x1   :  { %10 = vsyncpa [#allocation3 + $0x1], 0  ;;  %s605_s12 = smov 0   ;;  %s607_s13 = smov 0  }
   0x2   :  { %s609_s14 = smov 0   ;;  %s611_s15 = smov 0  }
   0x3 LB: > { %s626_s16 = sadd.s32 4294967295, %s580_s15   ;;  %s421_s17 = sadd.s32 4294967294, %s580_s15   ;;  %s580_s15 = sphi %s611_s15, %s760_s15   ;;  %s576_s14 = sphi %s609_s14, %s759_s14   ;;  %s572_s13 = sphi %s607_s13, %s758_s13   ;;  %s568_s12 = sphi %s605_s12, %s757_s12  }
   0x4   : > { %s630_s18 = sadd.s32 1, %s580_s15   ;;  %s91_s19 = sadd.s32 1, %s576_s14 }
   0x5   : > { %s88_s20 = ssub.s32 %s580_s15, %s630_s18  ;;  %p101_p0 = scmp.ne.s32.totalorder %s576_s14, %s572_s13 }
   0x6   : > { %p89_p1 = scmp.eq.s32.totalorder %s88_s20, 0  ;;  %p102_p2 = scmp.eq.s32.totalorder %s626_s16, 1 }
   0x7   : > { %p107_p3 = scmp.ne.s32.totalorder %s572_s13, %s568_s12  ;;  %p108_p4 = scmp.eq.s32.totalorder %s421_s17, 1 }
   0x8   : > { %s641_s21 = scalar_select %p89_p1, %s576_s14, %s91_s19  }
   0x9   : > { %p643_p5 = por %p102_p2, %p101_p0  ;;  %p647_p6 = por %p108_p4, %p107_p3 }
   0xa   : > { %p424_p7 = scmp.ge.s32.totalorder %s580_s15, 1  ;;  %p149_p8 = scmp.lt.s32.totalorder %s580_s15, 3 }
   0xc   : > { %p150_p9 = pnand %p424_p7, %p149_p8 }
   0xd   : > { %s657_s26 = smul.u32 (!%p150_p9), 7, %s626_s16  ;;  %s174_s7 = sand.u32 (!%p150_p9), 1, %s572_s13  }
   0xe   : > { %153 = sbr.rel (%p150_p9) target bundleno = 275 (0x113), region = 32  ;;  %s691_s17 = scalar_lea.sflag (!%p150_p9), [#allocation3], %s174_s7 }
   0xf   : > { %p182_p10 = scmp.lt.s32.totalorder (!%p150_p9), %s657_s26, 12  ;;  %s463_s10 = smul.u32 (!%p150_p9), 56, %s174_s7 }
  0x11   : > { %s674_s11 = scalar_lea.vmem (!%p150_p9), [#allocation2], %s463_s10 }
  0x13   : > { %v504_v0 = vld [vmem:[%s752_s1 + $0x8] sm:$0xff]   ;;  %v505_v1 = vld [vmem:[%s752_s1] sm:$0xff]   ;;  %s183_s29 = scalar_select %p182_p10, %s657_s26, 12  ;;  %vm231_vm0 = vcmask 261120   ;;  %v308_v33 = vlaneseq }
  0x14   : > { %447 = vmatprep.subr.bf16.mxu0 %v504_v0  ;;  %459 = vmatprep.subr.bf16.mxu1 %v504_v0  ;;  %v426_v13 = vld [vmem:[%s753_s2] ss:$0 sm:$0xff]  ;;  %s348_s19 = ssub.s32 (%p643_p5), 13, %s657_s26 }
  0x15   : > { %448 = vmatpush3.bf16.msra.mxu0 %v504_v0  ;;  %461 = vmatpush3.bf16.msra.mxu1 %v504_v0  ;;  %s425_s30 = sshll.u32 %s183_s29, 3  ;;  %v309_v37 = vand.u32 127, %v308_v33  ;;  %p349_p11 = scmp.lt.s32.totalorder (%p643_p5), %s348_s19, 7 }
  0x16   : > { %449 = vmatprep.subr.bf16.mxu0 %v505_v1  ;;  %460 = vmatprep.subr.bf16.mxu1 %v505_v1  ;;  %s185_s6 = scalar_lea.vmem %s751_s0, %s425_s30 }
  0x17   : > { %v197_v2 = vld [vmem:[%s185_s6] sm:$0xff]  ;;  %v198_v3 = vld [vmem:[%s185_s6 + $0x8] sm:$0xff]  ;;  %v199_v7 = vld [vmem:[%s185_s6 + $0x10] sm:$0xff]  ;;  %vm310_vm1 = vcmp.ge.s32.totalorder %v309_v37, 8 }
  0x18   : > { %v201_v4 = vld [vmem:[%s185_s6 + $0x20] sm:$0xff]  ;;  %v204_v5 = vpack.c.bf16 %v198_v3, %v197_v2  ;;  %v202_v6 = vld [vmem:[%s185_s6 + $0x28] sm:$0xff]  ;;  %v200_v8 = vld [vmem:[%s185_s6 + $0x18] sm:$0xff] }
  0x19   : > { %450 = vmatpush3.bf16.msra.mxu0 %v505_v1  ;;  %462 = vmatpush3.bf16.msra.mxu1 %v505_v1  ;;  %v206_v9 = vpack.c.bf16 %v202_v6, %v201_v4  ;;  %v205_v10 = vpack.c.bf16 %v200_v8, %v199_v7  ;;  %v203_v11 = vld [vmem:[%s185_s6 + $0x30] sm:$0xff] }
  0x1a   : > { %451 = vmatprep.mubr.msk.bf16.mxu0 %vm231_vm0, %v204_v5  ;;  %v207_v12 = vpack.c.bf16 %v203_v11, %v203_v11 }
  0x1b   : > { %455 = vmatprep.mubr.msk.bf16.mxu1 %vm231_vm0, %v206_v9 }
  0x1c   : > { %452 = vmatmul.mubr.msk.bf16.vlgmr.msra.gmra.mxu0 %vm231_vm0, %v205_v10  ;;  %456 = vmatmul.mubr.msk.bf16.vlgmr.msra.gmra.mxu1 %vm231_vm0, %v207_v12 }
  0xdc   : > { %v453_v14 = vpop.f32.mrf.mxu0  ;;  %v457_v16 = vpop.f32.mrf.mxu1 }
  0xdd   : > { %v287_v15 = vadd.f32 %v453_v14, %v426_v13  ;;  %v303_v17 = vadd.f32 %v457_v16, %v426_v13 }
  0xde   : > { %v278_v18 = vpop.f32.mrf.mxu0  ;;  %v294_v21 = vpop.f32.mrf.mxu1 }
  0xdf   : > { %v315_v19 = vmul.f32 1.442695, %v287_v15  ;;  %v279_v20 = vadd.f32 %v426_v13, %v278_v18  ;;  %v323_v22 = vmul.f32 1.442695, %v303_v17  ;;  %v295_v23 = vadd.f32 %v426_v13, %v294_v21 }
  0xe0   : > { %v454_v24 = vpop.f32.mrf.mxu0  ;;  %v458_v27 = vpop.f32.mrf.mxu1 }
  0xe1   : > { %506 = vpow2.f32 %v315_v19  ;;  %v311_v25 = vmul.f32 1.442695, %v279_v20  ;;  %v290_v26 = vadd.f32 %v454_v24, %v426_v13  ;;  %v319_v28 = vmul.f32 1.442695, %v295_v23 }
  0xe2   : > { %508 = vpow2.f32 %v323_v22  ;;  %v281_v29 = vpop.f32.mrf.mxu0  ;;  %v297_v32 = vpop.f32.mrf.mxu1 }
  0xe3   : > { %510 = vpow2.f32 %v311_v25  ;;  %v317_v30 = vmul.f32 1.442695, %v290_v26  ;;  %v282_v31 = vadd.f32 %v426_v13, %v281_v29  ;;  %v298_v34 = vadd.f32 %v426_v13, %v297_v32 }
  0xe4   : > { %512 = vpow2.f32 %v319_v28 }
  0xe5   : > { %514 = vpow2.f32 %v317_v30  ;;  %v313_v35 = vmul.f32 1.442695, %v282_v31  ;;  %v321_v36 = vmul.f32 1.442695, %v298_v34 }
  0xe7   : > { %516 = vpow2.f32 %v313_v35 }
  0xe8   : > { %518 = vpow2.f32 %v321_v36 }
  0xee   : > { %v507_v38 = vpop.eup %506 }
  0xef   : > { %v509_v39 = vpop.eup %508  ;;  %v327_v40 = vsel %vm310_vm1, %v507_v38, %v287_v15 }
  0xf0   : > { %v511_v41 = vpop.eup %510  ;;  %334 = vst [vmem:[%s674_s11 + $0x10] sm:$0xff] %v327_v40  ;;  %v331_v42 = vsel %vm310_vm1, %v509_v39, %v303_v17 }
  0xf1   : > { %v513_v43 = vpop.eup %512  ;;  %338 = vst [vmem:[%s674_s11 + $0x30] sm:$0xff] %v331_v42  ;;  %v325_v44 = vsel %vm310_vm1, %v511_v41, %v279_v20 }
  0xf2   : > { %v515_v45 = vpop.eup %514  ;;  %332 = vst [vmem:[%s674_s11] sm:$0xff] %v325_v44  ;;  %v329_v46 = vsel %vm310_vm1, %v513_v43, %v295_v23 }
  0xf3   : > { %336 = vst [vmem:[%s674_s11 + $0x20] sm:$0xff] %v329_v46  ;;  %v328_v47 = vsel %vm310_vm1, %v515_v45, %v290_v26  ;;  %346 = sbr.rel (!%p643_p5) target bundleno = 275 (0x113), region = 36 }
  0xf4   : > { %v517_v48 = vpop.eup %516  ;;  %335 = vst [vmem:[%s674_s11 + $0x18] sm:$0xff] %v328_v47 }
  0xf5   : > { %v519_v49 = vpop.eup %518  ;;  %v326_v50 = vsel %vm310_vm1, %v517_v48, %v282_v31 }
  0xf6   : > { %333 = vst [vmem:[%s674_s11 + $0x8] sm:$0xff] %v326_v50  ;;  %v330_v51 = vsel %vm310_vm1, %v519_v49, %v298_v34 }
  0xf7   : > { %337 = vst [vmem:[%s674_s11 + $0x28] sm:$0xff] %v330_v51 }
  0xf8   : > { %s762_s19 = smov (!%p349_p11, %s348_s19), 7 }
  0xf9   : > { %s696_s20 = sshll.u32 %s762_s19, 7 }
  0xfa   : > { %s353_s24 = ssub.s32 896, %s696_s20 }
  0xfb   : > { %354 = vsyncadd %s691_s17, %s353_s24  ;;  %p434_p12 = scmp.ne.s32.totalorder %s696_s20, 0  ;;  %s440_s25 = smul.u32 896, %s626_s16 }
  0xfc   : > { %s359_s27 = sshll.u32 %s674_s11, 4  ;;  %s582_s30 = smov [#allocation2]   ;;  %s708_s27 = int_to_ptr.vmem [resolvable:$true] %s359_s27 }
  0xfd   : > { %s706_s29 = scalar_lea.hbm %s754_s3, %s440_s25  ;;  %s520_s26 = scalar_lea.vmem %s708_s27, %s696_s20 }
  0xfe   : > { %p521_p13 = scmp.ne.s32.totalorder %s708_s27, %s520_s26  ;;  %s524_s4 = sshll.u32 %s582_s30, 4  ;;  %s525_s4 = int_to_ptr.vmem [resolvable:$false] %s524_s4 }
  0xff   : > { %s526_s16 = scalar_lea.vmem %s525_s4, 1792  ;;  %p527_p2 = scmp.lt.s32.totalorder %s708_s27, %s525_s4 }
 0x100   : > { %p522_p0 = pnand %p521_p13, %p434_p12  ;;  %p528_p3 = scmp.lt.s32.totalorder %s526_s16, %s520_s26 }
 0x102   : > { %p523_p1 = pneg %p522_p0  ;;  %p529_p4 = por %p528_p3, %p527_p2 }
 0x104   : > { %p530_p5 = pnand %p529_p4, %p523_p1 }
 0x106   : > { %533 = shalt.err (!%p530_p5)
}
 0x107   : > { %s534_s5 = scalar_lea.hbm %s706_s29, %s696_s20  ;;  %s538_s8 = scalar_lea.hbm %s754_s3, 1664 }
 0x108   : > { %p535_p7 = scmp.ne.s32.totalorder %s706_s29, %s534_s5  ;;  %p539_p10 = scmp.lt.s32.totalorder %s706_s29, %s754_s3 }
 0x109   : > { %p540_p11 = scmp.lt.s32.totalorder %s538_s8, %s534_s5 }
 0x10a   : > { %p536_p8 = pnand %p535_p7, %p434_p12 }
 0x10b   : > { %p541_p13 = por %p540_p11, %p539_p10 }
 0x10c   : > { %p537_p9 = pneg %p536_p8 }
 0x10e   : > { %p542_p0 = pnand %p541_p13, %p537_p9 }
 0x110   : > { %545 = shalt.err (!%p542_p0)
}
 0x111   : > { %s583_s11 = smov 128   ;;  %s584_s19 = smov 8  }
 0x112   : > { %365 = dma.vmem_to_hbm [thread:$0]  (%p434_p12), %s708_s27, %s696_s20, %s706_s29, %s691_s17, %s583_s11, %s583_s11, %s584_s19  }
 0x113 PF: > { %p469_p1 = scmp.ge.s32.totalorder %s580_s15, 2  ;;  %s374_s24 = sand.u32 1, %s568_s12  }
 0x114   : > { %s375_s25 = scalar_lea.sflag [#allocation3], %s374_s24 }
 0x115   : > { %p466_p2 = pnand %p469_p1, %p647_p6 }
 0x117   : > { %p467_p3 = pneg %p466_p2 }
 0x119   : > { %563 = dma.done.wait (%p467_p3), %s375_s25, 896  }
 0x11a   : > { %565 = vsyncadd (%p467_p3), %s375_s25, 4294966400  ;;  %p13_p4 = scmp.ge.s32.totalorder %s630_s18, 4   ;;  %s757_s12 = smov %s572_s13 }
 0x11b   : > { %s758_s13 = smov %s576_s14  ;;  %s759_s14 = smov %s641_s21 }
 0x11c   : > { %s760_s15 = smov %s630_s18  ;;  %15 = sbr.rel (!%p13_p4) target bundleno = 3 (0x3), region = 67 }
 0x121   :  { %380 = vsyncpa [#allocation3], 1 }
 0x122   :  { %382 = vsyncpa [#allocation3 + $0x1], 1 }

// kernel: tpu_custom_call.1
= control target key start
LH: loop header
LB: loop body
LE: loop exit
PB: predicated region body
PF: predicated region fallthrough
CT: control target
= control target key end

     0   :  { %8 = vsyncpa [#allocation3], 0  ;;  %s751_s0 = inlined_call_operand.vmem [shape: f32[100,32], index: 0, kind: input, shape index: {}]   ;;  %s752_s1 = inlined_call_operand.vmem [shape: bf16[32,128], index: 1, kind: input, shape index: {}]   ;;  %s753_s2 = inlined_call_operand.vmem [shape: f32[1,128], index: 2, kind: input, shape index: {}]   ;;  %s754_s3 = inlined_call_operand.hbm [shape: f32[100,128], index: 3, kind: output, shape index: {}]  }
   0x1   :  { %10 = vsyncpa [#allocation3 + $0x1], 0  ;;  %s605_s12 = smov 0   ;;  %s607_s13 = smov 0  }
   0x2   :  { %s609_s14 = smov 0   ;;  %s611_s15 = smov 0  }
   0x3 LB: > { %s626_s16 = sadd.s32 4294967295, %s580_s15   ;;  %s421_s17 = sadd.s32 4294967294, %s580_s15   ;;  %s580_s15 = sphi %s611_s15, %s760_s15   ;;  %s576_s14 = sphi %s609_s14, %s759_s14   ;;  %s572_s13 = sphi %s607_s13, %s758_s13   ;;  %s568_s12 = sphi %s605_s12, %s757_s12  }
   0x4   : > { %s630_s18 = sadd.s32 1, %s580_s15   ;;  %s91_s19 = sadd.s32 1, %s576_s14 }
   0x5   : > { %s88_s20 = ssub.s32 %s580_s15, %s630_s18  ;;  %p101_p0 = scmp.ne.s32.totalorder %s576_s14, %s572_s13 }
   0x6   : > { %p89_p1 = scmp.eq.s32.totalorder %s88_s20, 0  ;;  %p102_p2 = scmp.eq.s32.totalorder %s626_s16, 1 }
   0x7   : > { %p107_p3 = scmp.ne.s32.totalorder %s572_s13, %s568_s12  ;;  %p108_p4 = scmp.eq.s32.totalorder %s421_s17, 1 }
   0x8   : > { %s641_s21 = scalar_select %p89_p1, %s576_s14, %s91_s19  }
   0x9   : > { %p643_p5 = por %p102_p2, %p101_p0  ;;  %p647_p6 = por %p108_p4, %p107_p3 }
   0xa   : > { %p424_p7 = scmp.ge.s32.totalorder %s580_s15, 1  ;;  %p149_p8 = scmp.lt.s32.totalorder %s580_s15, 3 }
   0xc   : > { %p150_p9 = pnand %p424_p7, %p149_p8 }
   0xd   : > { %s657_s26 = smul.u32 (!%p150_p9), 7, %s626_s16  ;;  %s174_s7 = sand.u32 (!%p150_p9), 1, %s572_s13  }
   0xe   : > { %153 = sbr.rel (%p150_p9) target bundleno = 275 (0x113), region = 32  ;;  %s691_s17 = scalar_lea.sflag (!%p150_p9), [#allocation3], %s174_s7 }
   0xf   : > { %p182_p10 = scmp.lt.s32.totalorder (!%p150_p9), %s657_s26, 12  ;;  %s463_s10 = smul.u32 (!%p150_p9), 56, %s174_s7 }
  0x11   : > { %s674_s11 = scalar_lea.vmem (!%p150_p9), [#allocation2], %s463_s10 }
  0x13   : > { %v504_v0 = vld [vmem:[%s752_s1 + $0x8] sm:$0xff]   ;;  %v505_v1 = vld [vmem:[%s752_s1] sm:$0xff]   ;;  %s183_s29 = scalar_select %p182_p10, %s657_s26, 12  ;;  %vm231_vm0 = vcmask 261120   ;;  %v308_v33 = vlaneseq }
  0x14   : > { %447 = vmatprep.subr.bf16.mxu0 %v504_v0  ;;  %459 = vmatprep.subr.bf16.mxu1 %v504_v0  ;;  %v426_v13 = vld [vmem:[%s753_s2] ss:$0 sm:$0xff]  ;;  %s348_s19 = ssub.s32 (%p643_p5), 13, %s657_s26 }
  0x15   : > { %448 = vmatpush3.bf16.msra.mxu0 %v504_v0  ;;  %461 = vmatpush3.bf16.msra.mxu1 %v504_v0  ;;  %s425_s30 = sshll.u32 %s183_s29, 3  ;;  %v309_v37 = vand.u32 127, %v308_v33  ;;  %p349_p11 = scmp.lt.s32.totalorder (%p643_p5), %s348_s19, 7 }
  0x16   : > { %449 = vmatprep.subr.bf16.mxu0 %v505_v1  ;;  %460 = vmatprep.subr.bf16.mxu1 %v505_v1  ;;  %s185_s6 = scalar_lea.vmem %s751_s0, %s425_s30 }
  0x17   : > { %v197_v2 = vld [vmem:[%s185_s6] sm:$0xff]  ;;  %v198_v3 = vld [vmem:[%s185_s6 + $0x8] sm:$0xff]  ;;  %v199_v7 = vld [vmem:[%s185_s6 + $0x10] sm:$0xff]  ;;  %vm310_vm1 = vcmp.ge.s32.totalorder %v309_v37, 8 }
  0x18   : > { %v201_v4 = vld [vmem:[%s185_s6 + $0x20] sm:$0xff]  ;;  %v204_v5 = vpack.c.bf16 %v198_v3, %v197_v2  ;;  %v202_v6 = vld [vmem:[%s185_s6 + $0x28] sm:$0xff]  ;;  %v200_v8 = vld [vmem:[%s185_s6 + $0x18] sm:$0xff] }
  0x19   : > { %450 = vmatpush3.bf16.msra.mxu0 %v505_v1  ;;  %462 = vmatpush3.bf16.msra.mxu1 %v505_v1  ;;  %v206_v9 = vpack.c.bf16 %v202_v6, %v201_v4  ;;  %v205_v10 = vpack.c.bf16 %v200_v8, %v199_v7  ;;  %v203_v11 = vld [vmem:[%s185_s6 + $0x30] sm:$0xff] }
  0x1a   : > { %451 = vmatprep.mubr.msk.bf16.mxu0 %vm231_vm0, %v204_v5  ;;  %v207_v12 = vpack.c.bf16 %v203_v11, %v203_v11 }
  0x1b   : > { %455 = vmatprep.mubr.msk.bf16.mxu1 %vm231_vm0, %v206_v9 }
  0x1c   : > { %452 = vmatmul.mubr.msk.bf16.vlgmr.msra.gmra.mxu0 %vm231_vm0, %v205_v10  ;;  %456 = vmatmul.mubr.msk.bf16.vlgmr.msra.gmra.mxu1 %vm231_vm0, %v207_v12 }
  0xdc   : > { %v453_v14 = vpop.f32.mrf.mxu0  ;;  %v457_v16 = vpop.f32.mrf.mxu1 }
  0xdd   : > { %v287_v15 = vadd.f32 %v453_v14, %v426_v13  ;;  %v303_v17 = vadd.f32 %v457_v16, %v426_v13 }
  0xde   : > { %v278_v18 = vpop.f32.mrf.mxu0  ;;  %v294_v21 = vpop.f32.mrf.mxu1 }
  0xdf   : > { %v315_v19 = vmul.f32 1.442695, %v287_v15  ;;  %v279_v20 = vadd.f32 %v426_v13, %v278_v18  ;;  %v323_v22 = vmul.f32 1.442695, %v303_v17  ;;  %v295_v23 = vadd.f32 %v426_v13, %v294_v21 }
  0xe0   : > { %v454_v24 = vpop.f32.mrf.mxu0  ;;  %v458_v27 = vpop.f32.mrf.mxu1 }
  0xe1   : > { %506 = vpow2.f32 %v315_v19  ;;  %v311_v25 = vmul.f32 1.442695, %v279_v20  ;;  %v290_v26 = vadd.f32 %v454_v24, %v426_v13  ;;  %v319_v28 = vmul.f32 1.442695, %v295_v23 }
  0xe2   : > { %508 = vpow2.f32 %v323_v22  ;;  %v281_v29 = vpop.f32.mrf.mxu0  ;;  %v297_v32 = vpop.f32.mrf.mxu1 }
  0xe3   : > { %510 = vpow2.f32 %v311_v25  ;;  %v317_v30 = vmul.f32 1.442695, %v290_v26  ;;  %v282_v31 = vadd.f32 %v426_v13, %v281_v29  ;;  %v298_v34 = vadd.f32 %v426_v13, %v297_v32 }
  0xe4   : > { %512 = vpow2.f32 %v319_v28 }
  0xe5   : > { %514 = vpow2.f32 %v317_v30  ;;  %v313_v35 = vmul.f32 1.442695, %v282_v31  ;;  %v321_v36 = vmul.f32 1.442695, %v298_v34 }
  0xe7   : > { %516 = vpow2.f32 %v313_v35 }
  0xe8   : > { %518 = vpow2.f32 %v321_v36 }
  0xee   : > { %v507_v38 = vpop.eup %506 }
  0xef   : > { %v509_v39 = vpop.eup %508  ;;  %v327_v40 = vsel %vm310_vm1, %v507_v38, %v287_v15 }
  0xf0   : > { %v511_v41 = vpop.eup %510  ;;  %334 = vst [vmem:[%s674_s11 + $0x10] sm:$0xff] %v327_v40  ;;  %v331_v42 = vsel %vm310_vm1, %v509_v39, %v303_v17 }
  0xf1   : > { %v513_v43 = vpop.eup %512  ;;  %338 = vst [vmem:[%s674_s11 + $0x30] sm:$0xff] %v331_v42  ;;  %v325_v44 = vsel %vm310_vm1, %v511_v41, %v279_v20 }
  0xf2   : > { %v515_v45 = vpop.eup %514  ;;  %332 = vst [vmem:[%s674_s11] sm:$0xff] %v325_v44  ;;  %v329_v46 = vsel %vm310_vm1, %v513_v43, %v295_v23 }
  0xf3   : > { %336 = vst [vmem:[%s674_s11 + $0x20] sm:$0xff] %v329_v46  ;;  %v328_v47 = vsel %vm310_vm1, %v515_v45, %v290_v26  ;;  %346 = sbr.rel (!%p643_p5) target bundleno = 275 (0x113), region = 36 }
  0xf4   : > { %v517_v48 = vpop.eup %516  ;;  %335 = vst [vmem:[%s674_s11 + $0x18] sm:$0xff] %v328_v47 }
  0xf5   : > { %v519_v49 = vpop.eup %518  ;;  %v326_v50 = vsel %vm310_vm1, %v517_v48, %v282_v31 }
  0xf6   : > { %333 = vst [vmem:[%s674_s11 + $0x8] sm:$0xff] %v326_v50  ;;  %v330_v51 = vsel %vm310_vm1, %v519_v49, %v298_v34 }
  0xf7   : > { %337 = vst [vmem:[%s674_s11 + $0x28] sm:$0xff] %v330_v51 }
  0xf8   : > { %s762_s19 = smov (!%p349_p11, %s348_s19), 7 }
  0xf9   : > { %s696_s20 = sshll.u32 %s762_s19, 7 }
  0xfa   : > { %s353_s24 = ssub.s32 896, %s696_s20 }
  0xfb   : > { %354 = vsyncadd %s691_s17, %s353_s24  ;;  %p434_p12 = scmp.ne.s32.totalorder %s696_s20, 0  ;;  %s440_s25 = smul.u32 896, %s626_s16 }
  0xfc   : > { %s359_s27 = sshll.u32 %s674_s11, 4  ;;  %s582_s30 = smov [#allocation2]   ;;  %s708_s27 = int_to_ptr.vmem [resolvable:$true] %s359_s27 }
  0xfd   : > { %s706_s29 = scalar_lea.hbm %s754_s3, %s440_s25  ;;  %s520_s26 = scalar_lea.vmem %s708_s27, %s696_s20 }
  0xfe   : > { %p521_p13 = scmp.ne.s32.totalorder %s708_s27, %s520_s26  ;;  %s524_s4 = sshll.u32 %s582_s30, 4  ;;  %s525_s4 = int_to_ptr.vmem [resolvable:$false] %s524_s4 }
  0xff   : > { %s526_s16 = scalar_lea.vmem %s525_s4, 1792  ;;  %p527_p2 = scmp.lt.s32.totalorder %s708_s27, %s525_s4 }
 0x100   : > { %p522_p0 = pnand %p521_p13, %p434_p12  ;;  %p528_p3 = scmp.lt.s32.totalorder %s526_s16, %s520_s26 }
 0x102   : > { %p523_p1 = pneg %p522_p0  ;;  %p529_p4 = por %p528_p3, %p527_p2 }
 0x104   : > { %p530_p5 = pnand %p529_p4, %p523_p1 }
 0x106   : > { %533 = shalt.err (!%p530_p5)
}
 0x107   : > { %s534_s5 = scalar_lea.hbm %s706_s29, %s696_s20  ;;  %s538_s8 = scalar_lea.hbm %s754_s3, 1664 }
 0x108   : > { %p535_p7 = scmp.ne.s32.totalorder %s706_s29, %s534_s5  ;;  %p539_p10 = scmp.lt.s32.totalorder %s706_s29, %s754_s3 }
 0x109   : > { %p540_p11 = scmp.lt.s32.totalorder %s538_s8, %s534_s5 }
 0x10a   : > { %p536_p8 = pnand %p535_p7, %p434_p12 }
 0x10b   : > { %p541_p13 = por %p540_p11, %p539_p10 }
 0x10c   : > { %p537_p9 = pneg %p536_p8 }
 0x10e   : > { %p542_p0 = pnand %p541_p13, %p537_p9 }
 0x110   : > { %545 = shalt.err (!%p542_p0)
}
 0x111   : > { %s583_s11 = smov 128   ;;  %s584_s19 = smov 8  }
 0x112   : > { %365 = dma.vmem_to_hbm [thread:$0]  (%p434_p12), %s708_s27, %s696_s20, %s706_s29, %s691_s17, %s583_s11, %s583_s11, %s584_s19  }
 0x113 PF: > { %p469_p1 = scmp.ge.s32.totalorder %s580_s15, 2  ;;  %s374_s24 = sand.u32 1, %s568_s12  }
 0x114   : > { %s375_s25 = scalar_lea.sflag [#allocation3], %s374_s24 }
 0x115   : > { %p466_p2 = pnand %p469_p1, %p647_p6 }
 0x117   : > { %p467_p3 = pneg %p466_p2 }
 0x119   : > { %563 = dma.done.wait (%p467_p3), %s375_s25, 896  }
 0x11a   : > { %565 = vsyncadd (%p467_p3), %s375_s25, 4294966400  ;;  %p13_p4 = scmp.ge.s32.totalorder %s630_s18, 4   ;;  %s757_s12 = smov %s572_s13 }
 0x11b   : > { %s758_s13 = smov %s576_s14  ;;  %s759_s14 = smov %s641_s21 }
 0x11c   : > { %s760_s15 = smov %s630_s18  ;;  %15 = sbr.rel (!%p13_p4) target bundleno = 3 (0x3), region = 67 }
 0x121   :  { %380 = vsyncpa [#allocation3], 1 }
 0x122   :  { %382 = vsyncpa [#allocation3 + $0x1], 1 }

</bundles_post_ra>
